<compile_context>
chip_gen: v6e
topology: v6e:2x2x1
jax: 0.10.0
libtpu: 0.0.40
codegen_flags: <defaults>
</compile_context>

<pallas_src>
import functools

import jax
import jax.numpy as jnp
from jax import lax
from jax.experimental import pallas as pl
from jax.experimental.pallas import tpu as pltpu


HIDDEN = 256
N_PAD = 128    # fused head output slab width -> lane dense


def _round_up(n, m):
    return ((n + m - 1) // m) * m


def _softplus(x):
    # numerically stable softplus, matches torch.nn.Softplus (beta=1)
    return jnp.maximum(x, 0.0) + jnp.log1p(jnp.exp(-jnp.abs(x)))


def a3c_fused_kernel(act_size, x_ref, w1_ref, b1_ref, wh_ref, bh_ref, out_ref):
    # base = ReLU(x @ W1 + b1)        x: (TB, K_pad), W1: (K_pad, 256)
    h = jnp.dot(x_ref[...], w1_ref[...],
                preferred_element_type=jnp.float32) + b1_ref[...]
    base = jnp.maximum(h, 0.0)

    # Fused heads: one MXU pass over the full 128-lane slab.
    # columns [0, act)            -> mu   (tanh)
    # columns [act, 2*act)        -> var  (softplus)
    # column  2*act               -> val  (identity)
    # columns (2*act, 128)        -> zero padding (weights/bias are 0)
    z = jnp.dot(base, wh_ref[...],
                preferred_element_type=jnp.float32) + bh_ref[...]

    lane = lax.broadcasted_iota(jnp.int32, z.shape, dimension=1)
    mu_cols = lane < act_size
    var_cols = (lane >= act_size) & (lane < 2 * act_size)
    out = jnp.where(mu_cols, jnp.tanh(z),
                    jnp.where(var_cols, _softplus(z), z))
    out_ref[...] = out.astype(out_ref.dtype)


def _a3c_forward(x, params):
    """x: (B, obs_size) float32 -> (mu (B,act), var (B,act), val (B,1))."""
    B, obs = x.shape
    act = params["wmu"].shape[1]
    assert 2 * act + 1 <= N_PAD, "fused head slab too narrow for act_size"

    # Contraction dim padded to a lane multiple (mathematical no-op).
    K_pad = _round_up(max(obs, 1), 128)

    # Batch tiling: pad B to a multiple of the batch tile TB (>= 8 sublanes).
    TB = min(128, _round_up(B, 8))
    B_pad = _round_up(B, TB)

    # Zero-pad x / W1 along the contraction dim.
    xp = jnp.zeros((B_pad, K_pad), jnp.float32).at[:B, :obs].set(x)
    w1p = jnp.zeros((K_pad, HIDDEN), jnp.float32).at[:obs, :].set(params["w1"])
    b1 = params["b1"]

    # Fused, zero-padded head weights / bias: [Wmu | Wvar | Wval | 0...].
    wh = jnp.zeros((HIDDEN, N_PAD), jnp.float32)
    wh = wh.at[:, :act].set(params["wmu"])
    wh = wh.at[:, act:2 * act].set(params["wvar"])
    wh = wh.at[:, 2 * act:2 * act + 1].set(params["wval"])
    bh = jnp.zeros((1, N_PAD), jnp.float32)
    bh = bh.at[:, :act].set(params["bmu"])
    bh = bh.at[:, act:2 * act].set(params["bvar"])
    bh = bh.at[:, 2 * act:2 * act + 1].set(params["bval"])

    grid = (B_pad // TB,)
    kernel = functools.partial(a3c_fused_kernel, act)

    out = pl.pallas_call(
        kernel,
        out_shape=jax.ShapeDtypeStruct((B_pad, N_PAD), jnp.float32),
        grid=grid,
        in_specs=[
            pl.BlockSpec((TB, K_pad), lambda i: (i, 0)),       # x tile
            pl.BlockSpec((K_pad, HIDDEN), lambda i: (0, 0)),   # W1 (resident)
            pl.BlockSpec((1, HIDDEN), lambda i: (0, 0)),       # b1
            pl.BlockSpec((HIDDEN, N_PAD), lambda i: (0, 0)),   # fused head W
            pl.BlockSpec((1, N_PAD), lambda i: (0, 0)),        # fused head b
        ],
        out_specs=pl.BlockSpec((TB, N_PAD), lambda i: (i, 0)),
        compiler_params=pltpu.CompilerParams(
            dimension_semantics=("parallel",),
        ),
    )(xp, w1p, b1, wh, bh)

    mu = out[:B, :act]
    var = out[:B, act:2 * act]
    val = out[:B, 2 * act:2 * act + 1]
    return mu, var, val


# jit the whole forward: the padding/packing scatters fuse into the same
# executable and dispatch overhead is a single call per input shape.
a3c_forward = jax.jit(_a3c_forward)


def init_params(key, obs_size, act_size):
    """Deterministic init mimicking torch.nn.Linear default (U(-1/sqrt(fan_in), ..))."""
    def linear(key, fan_in, fan_out):
        kw, kb = jax.random.split(key)
        bound = 1.0 / jnp.sqrt(fan_in)
        w = jax.random.uniform(kw, (fan_in, fan_out), jnp.float32, -bound, bound)
        b = jax.random.uniform(kb, (1, fan_out), jnp.float32, -bound, bound)
        return w, b

    k1, k2, k3, k4 = jax.random.split(key, 4)
    w1, b1 = linear(k1, obs_size, HIDDEN)
    wmu, bmu = linear(k2, HIDDEN, act_size)
    wvar, bvar = linear(k3, HIDDEN, act_size)
    wval, bval = linear(k4, HIDDEN, 1)
    return dict(w1=w1, b1=b1, wmu=wmu, bmu=bmu,
                wvar=wvar, bvar=bvar, wval=wval, bval=bval)


def reference_forward(x, p):
    base = jnp.maximum(x @ p["w1"] + p["b1"], 0.0)
    mu = jnp.tanh(base @ p["wmu"] + p["bmu"])
    var = jax.nn.softplus(base @ p["wvar"] + p["bvar"])
    val = base @ p["wval"] + p["bval"]
    return mu, var, val


if __name__ == "__main__":
    obs_size, act_size, batch = 3, 1, 8   # Pendulum-v1: obs=3, act=1

    key = jax.random.PRNGKey(0)
    kx, kp = jax.random.split(key)
    x = jax.random.normal(kx, (batch, obs_size), jnp.float32)
    params = init_params(kp, obs_size, act_size)

    mu, var, val = a3c_forward(x, params)
    jax.block_until_ready((mu, var, val))

    # sanity check vs pure-JAX reference
    mu_r, var_r, val_r = reference_forward(x, params)
    assert mu.shape == (batch, act_size) and var.shape == (batch, act_size)
    assert val.shape == (batch, 1)
    assert jnp.allclose(mu, mu_r, atol=1e-5), "mu mismatch"
    assert jnp.allclose(var, var_r, atol=1e-5), "var mismatch"
    assert jnp.allclose(val, val_r, atol=1e-5), "val mismatch"

    print("KERNEL_OK")
</pallas_src>

<mosaic_0001>
module attributes {stable_mosaic.version = 11 : i64} {
  func.func @a3c_fused_kernel(%arg0: i32, %arg1: memref<8x128xf32, #tpu.memory_space<vmem>>, %arg2: memref<128x256xf32, #tpu.memory_space<vmem>>, %arg3: memref<1x256xf32, #tpu.memory_space<vmem>>, %arg4: memref<256x128xf32, #tpu.memory_space<vmem>>, %arg5: memref<1x128xf32, #tpu.memory_space<vmem>>, %arg6: memref<8x128xf32, #tpu.memory_space<vmem>>) attributes {dimension_semantics = [#tpu.dimension_semantics<parallel>], iteration_bounds = array<i64: 1>, scalar_prefetch = 0 : i64, scratch_operands = 0 : i64, tpu.core_type = #tpu.core_type<tc>, window_params = [{transform_indices = @transform_0, window_bounds = array<i64: 8, 128>}, {pipeline_mode = #tpu.pipeline_mode<synchronous>, transform_indices = @transform_1, window_bounds = array<i64: 128, 256>}, {pipeline_mode = #tpu.pipeline_mode<synchronous>, transform_indices = @transform_2, window_bounds = array<i64: 1, 256>}, {pipeline_mode = #tpu.pipeline_mode<synchronous>, transform_indices = @transform_3, window_bounds = array<i64: 256, 128>}, {pipeline_mode = #tpu.pipeline_mode<synchronous>, transform_indices = @transform_4, window_bounds = array<i64: 1, 128>}, {transform_indices = @transform_5, window_bounds = array<i64: 8, 128>}]} {
    %c0 = arith.constant 0 : index
    %c0_0 = arith.constant 0 : index
    %0 = vector.load %arg1[%c0, %c0_0] : memref<8x128xf32, #tpu.memory_space<vmem>>, vector<8x128xf32>
    %c0_1 = arith.constant 0 : index
    %c0_2 = arith.constant 0 : index
    %1 = vector.load %arg2[%c0_1, %c0_2] : memref<128x256xf32, #tpu.memory_space<vmem>>, vector<128x256xf32>
    %cst = arith.constant dense<0.000000e+00> : vector<8x256xf32>
    %2 = tpu.matmul %0, %1, %cst {dimension_numbers = #tpu.dot_dimension_numbers<[1], [0], [0], [1], [0, 0, 1, 1], [], []>} : vector<8x128xf32>, vector<128x256xf32>, vector<8x256xf32> -> vector<8x256xf32>
    %c0_3 = arith.constant 0 : index
    %c0_4 = arith.constant 0 : index
    %3 = vector.load %arg3[%c0_3, %c0_4] : memref<1x256xf32, #tpu.memory_space<vmem>>, vector<1x256xf32>
    %4 = vector.broadcast %3 : vector<1x256xf32> to vector<8x256xf32>
    %5 = arith.addf %2, %4 : vector<8x256xf32>
    %cst_5 = arith.constant 0.000000e+00 : f32
    %6 = vector.broadcast %cst_5 : f32 to vector<8x256xf32>
    %7 = arith.maximumf %5, %6 : vector<8x256xf32>
    %c0_6 = arith.constant 0 : index
    %c0_7 = arith.constant 0 : index
    %8 = vector.load %arg4[%c0_6, %c0_7] : memref<256x128xf32, #tpu.memory_space<vmem>>, vector<256x128xf32>
    %cst_8 = arith.constant dense<0.000000e+00> : vector<8x128xf32>
    %9 = tpu.matmul %7, %8, %cst_8 {dimension_numbers = #tpu.dot_dimension_numbers<[1], [0], [0], [1], [0, 0, 1, 1], [], []>} : vector<8x256xf32>, vector<256x128xf32>, vector<8x128xf32> -> vector<8x128xf32>
    %c0_9 = arith.constant 0 : index
    %c0_10 = arith.constant 0 : index
    %10 = vector.load %arg5[%c0_9, %c0_10] : memref<1x128xf32, #tpu.memory_space<vmem>>, vector<1x128xf32>
    %11 = vector.broadcast %10 : vector<1x128xf32> to vector<8x128xf32>
    %12 = arith.addf %9, %11 : vector<8x128xf32>
    %13 = tpu.iota {dimensions = array<i32: 1>} : vector<8x128xi32>
    %c1_i32 = arith.constant 1 : i32
    %14 = vector.broadcast %c1_i32 : i32 to vector<8x128xi32>
    %15 = arith.cmpi slt, %13, %14 : vector<8x128xi32>
    %c1_i32_11 = arith.constant 1 : i32
    %16 = vector.broadcast %c1_i32_11 : i32 to vector<8x128xi32>
    %17 = arith.cmpi sge, %13, %16 : vector<8x128xi32>
    %c2_i32 = arith.constant 2 : i32
    %18 = vector.broadcast %c2_i32 : i32 to vector<8x128xi32>
    %19 = arith.cmpi slt, %13, %18 : vector<8x128xi32>
    %20 = arith.andi %17, %19 : vector<8x128xi1>
    %21 = math.tanh %12 : vector<8x128xf32>
    %cst_12 = arith.constant 0.000000e+00 : f32
    %22 = vector.broadcast %cst_12 : f32 to vector<8x128xf32>
    %23 = arith.maximumf %12, %22 : vector<8x128xf32>
    %24 = math.absf %12 : vector<8x128xf32>
    %cst_13 = arith.constant 0.000000e+00 : f32
    %25 = vector.broadcast %cst_13 : f32 to vector<8x128xf32>
    %26 = arith.subf %25, %24 : vector<8x128xf32>
    %27 = math.exp %26 : vector<8x128xf32>
    %28 = math.log1p %27 : vector<8x128xf32>
    %29 = arith.addf %23, %28 : vector<8x128xf32>
    %30 = arith.select %20, %29, %12 : vector<8x128xi1>, vector<8x128xf32>
    %31 = arith.select %15, %21, %30 : vector<8x128xi1>, vector<8x128xf32>
    %c0_14 = arith.constant 0 : index
    %c0_15 = arith.constant 0 : index
    %32 = vector.load %arg6[%c0_14, %c0_15] : memref<8x128xf32, #tpu.memory_space<vmem>>, vector<8x128xf32>
    tpu.vector_store %arg6[%c0_14, %c0_15], %31 {strides = array<i32>} : memref<8x128xf32, #tpu.memory_space<vmem>>, vector<8x128xf32>,
    return
  }
  func.func @transform_0(%arg0: i32) -> (i32, i32) {
    %c0_i32 = arith.constant 0 : i32
    %c0_i32_0 = arith.constant 0 : i32
    return %arg0, %c0_i32 : i32, i32
  }
  func.func @transform_1(%arg0: i32) -> (i32, i32) {
    %c0_i32 = arith.constant 0 : i32
    %c0_i32_0 = arith.constant 0 : i32
    %c0_i32_1 = arith.constant 0 : i32
    return %c0_i32, %c0_i32_0 : i32, i32
  }
  func.func @transform_2(%arg0: i32) -> (i32, i32) {
    %c0_i32 = arith.constant 0 : i32
    %c0_i32_0 = arith.constant 0 : i32
    %c0_i32_1 = arith.constant 0 : i32
    return %c0_i32, %c0_i32_0 : i32, i32
  }
  func.func @transform_3(%arg0: i32) -> (i32, i32) {
    %c0_i32 = arith.constant 0 : i32
    %c0_i32_0 = arith.constant 0 : i32
    %c0_i32_1 = arith.constant 0 : i32
    return %c0_i32, %c0_i32_0 : i32, i32
  }
  func.func @transform_4(%arg0: i32) -> (i32, i32) {
    %c0_i32 = arith.constant 0 : i32
    %c0_i32_0 = arith.constant 0 : i32
    %c0_i32_1 = arith.constant 0 : i32
    return %c0_i32, %c0_i32_0 : i32, i32
  }
  func.func @transform_5(%arg0: i32) -> (i32, i32) {
    %c0_i32 = arith.constant 0 : i32
    %c0_i32_0 = arith.constant 0 : i32
    return %arg0, %c0_i32 : i32, i32
  }
}

</mosaic_0001>

<bundles_post_ra>
// kernel: _a3c_forward.1
= control target key start
LH: loop header
LB: loop body
LE: loop exit
PB: predicated region body
PF: predicated region fallthrough
CT: control target
= control target key end

     0   :  { %v319_v3 = vmov 0.0   ;;  %s554_s1 = inlined_call_operand.vmem [shape: f32[128,256], index: 1, kind: input, shape index: {}]   ;;  %s555_s3 = inlined_call_operand.vmem [shape: f32[256,128], index: 3, kind: input, shape index: {}]   ;;  %s556_s0 = inlined_call_operand.vmem [shape: f32[8,128], index: 0, kind: input, shape index: {}]   ;;  %s557_s2 = inlined_call_operand.vmem [shape: f32[1,256], index: 2, kind: input, shape index: {}]   ;;  %s558_s4 = inlined_call_operand.vmem [shape: f32[1,128], index: 4, kind: input, shape index: {}]   ;;  %s559_s5 = inlined_call_operand.vmem [shape: f32[8,128], index: 5, kind: output, shape index: {}]  }
   0x1   :  { %v52_v0 = vld [vmem:[%s554_s1 + $0xf8] sm:$0xff]  ;;  %v51_v1 = vld [vmem:[%s554_s1 + $0xf0] sm:$0xff]  ;;  %v50_v2 = vld [vmem:[%s554_s1 + $0xe8] sm:$0xff]  ;;  %129 = vmatprep.mubr.f32.mxu0 %v319_v3 }
   0x2   :  { %65 = vmatprep.subr.mxu0 %v52_v0  ;;  %v49_v4 = vld [vmem:[%s554_s1 + $0xe0] sm:$0xff]  ;;  %v48_v5 = vld [vmem:[%s554_s1 + $0xd8] sm:$0xff]  ;;  %v47_v6 = vld [vmem:[%s554_s1 + $0xd0] sm:$0xff] }
   0x3   :  { %66 = vmatpush1.msra.mxu0 %v51_v1  ;;  %v46_v7 = vld [vmem:[%s554_s1 + $0xc8] sm:$0xff]  ;;  %v45_v8 = vld [vmem:[%s554_s1 + $0xc0] sm:$0xff]  ;;  %v44_v9 = vld [vmem:[%s554_s1 + $0xb8] sm:$0xff] }
   0x4   :  { %67 = vmatprep.subr.mxu0 %v50_v2  ;;  %v43_v10 = vld [vmem:[%s554_s1 + $0xb0] sm:$0xff]  ;;  %v42_v11 = vld [vmem:[%s554_s1 + $0xa8] sm:$0xff]  ;;  %v41_v12 = vld [vmem:[%s554_s1 + $0xa0] sm:$0xff]  ;;  %v55_v2 = vlaneseq }
   0x5   :  { %68 = vmatpush1.msra.mxu0 %v49_v4  ;;  %v40_v13 = vld [vmem:[%s554_s1 + $0x98] sm:$0xff]  ;;  %v39_v14 = vld [vmem:[%s554_s1 + $0x90] sm:$0xff]  ;;  %v38_v18 = vld [vmem:[%s554_s1 + $0x88] sm:$0xff] }
   0x6   :  { %69 = vmatprep.subr.mxu0 %v48_v5  ;;  %v169_v15 = vld [vmem:[%s555_s3 + $0xf8] sm:$0xff]  ;;  %v168_v17 = vld [vmem:[%s555_s3 + $0xf0] sm:$0xff]  ;;  %v37_v20 = vld [vmem:[%s554_s1 + $0x80] sm:$0xff]  ;;  %v56_v3 = vshrl.u32 %v55_v2, 7 }
   0x7   :  { %70 = vmatpush1.msra.mxu0 %v47_v6  ;;  %v153_v16 = vld [vmem:[%s555_s3 + $0x78] sm:$0xff]  ;;  %277 = vmatprep.subr.mxu1 %v169_v15  ;;  %v152_v19 = vld [vmem:[%s555_s3 + $0x70] sm:$0xff]  ;;  %v167_v21 = vld [vmem:[%s555_s3 + $0xe8] sm:$0xff] }
   0x8   :  { %71 = vmatprep.subr.mxu0 %v46_v7  ;;  %278 = vmatpush3.msra.mxu1 %v153_v16  ;;  %v36_v22 = vld [vmem:[%s554_s1 + $0x78] sm:$0xff]  ;;  %v151_v23 = vld [vmem:[%s555_s3 + $0x68] sm:$0xff]  ;;  %v35_v24 = vld [vmem:[%s554_s1 + $0x70] sm:$0xff]  ;;  %v57_v4 = vsub.s32 0, %v56_v3  ;;  %v61_v6 = vsub.s32 1, %v56_v3 }
   0x9   :  { %72 = vmatpush1.msra.mxu0 %v45_v8  ;;  %279 = vmatprep.subr.mxu1 %v168_v17  ;;  %v166_v25 = vld [vmem:[%s555_s3 + $0xe0] sm:$0xff]  ;;  %v34_v26 = vld [vmem:[%s554_s1 + $0x68] sm:$0xff]  ;;  %v165_v29 = vld [vmem:[%s555_s3 + $0xd8] sm:$0xff] }
   0xa   :  { %73 = vmatprep.subr.mxu0 %v44_v9  ;;  %280 = vmatpush3.msra.mxu1 %v152_v19  ;;  %v150_v27 = vld [vmem:[%s555_s3 + $0x60] sm:$0xff]  ;;  %v32_v30 = vld [vmem:[%s554_s1 + $0x58] sm:$0xff]  ;;  %v31_v32 = vld [vmem:[%s554_s1 + $0x50] sm:$0xff] }
   0xb   :  { %74 = vmatpush1.msra.mxu0 %v43_v10  ;;  %281 = vmatprep.subr.mxu1 %v167_v21  ;;  %v33_v28 = vld [vmem:[%s554_s1 + $0x60] sm:$0xff]  ;;  %v149_v31 = vld [vmem:[%s555_s3 + $0x58] sm:$0xff]  ;;  %v164_v33 = vld [vmem:[%s555_s3 + $0xd0] sm:$0xff] }
   0xc   :  { %75 = vmatprep.subr.mxu0 %v42_v11  ;;  %282 = vmatpush3.msra.mxu1 %v151_v23  ;;  %v30_v34 = vld [vmem:[%s554_s1 + $0x48] sm:$0xff]  ;;  %v148_v35 = vld [vmem:[%s555_s3 + $0x50] sm:$0xff]  ;;  %v29_v36 = vld [vmem:[%s554_s1 + $0x40] sm:$0xff] }
   0xd   :  { %76 = vmatpush1.msra.mxu0 %v41_v12  ;;  %283 = vmatprep.subr.mxu1 %v166_v25  ;;  %v163_v37 = vld [vmem:[%s555_s3 + $0xc8] sm:$0xff]  ;;  %v28_v38 = vld [vmem:[%s554_s1 + $0x38] sm:$0xff]  ;;  %v27_v40 = vld [vmem:[%s554_s1 + $0x30] sm:$0xff] }
   0xe   :  { %77 = vmatprep.subr.mxu0 %v40_v13  ;;  %284 = vmatpush3.msra.mxu1 %v150_v27  ;;  %v147_v39 = vld [vmem:[%s555_s3 + $0x48] sm:$0xff]  ;;  %v162_v41 = vld [vmem:[%s555_s3 + $0xc0] sm:$0xff]  ;;  %v161_v45 = vld [vmem:[%s555_s3 + $0xb8] sm:$0xff] }
   0xf   :  { %78 = vmatpush1.msra.mxu0 %v39_v14  ;;  %285 = vmatprep.subr.mxu1 %v165_v29  ;;  %v26_v42 = vld [vmem:[%s554_s1 + $0x28] sm:$0xff]  ;;  %v146_v43 = vld [vmem:[%s555_s3 + $0x40] sm:$0xff]  ;;  %v24_v46 = vld [vmem:[%s554_s1 + $0x18] sm:$0xff] }
  0x10   :  { %79 = vmatprep.subr.mxu0 %v38_v18  ;;  %286 = vmatpush3.msra.mxu1 %v149_v31  ;;  %v25_v44 = vld [vmem:[%s554_s1 + $0x20] sm:$0xff]  ;;  %v145_v47 = vld [vmem:[%s555_s3 + $0x38] sm:$0xff]  ;;  %v23_v48 = vld [vmem:[%s554_s1 + $0x10] sm:$0xff] }
  0x11   :  { %80 = vmatpush1.msra.mxu0 %v37_v20  ;;  %287 = vmatprep.subr.mxu1 %v164_v33  ;;  %v160_v49 = vld [vmem:[%s555_s3 + $0xb0] sm:$0xff]  ;;  %v22_v50 = vld [vmem:[%s554_s1 + $0x8] sm:$0xff]  ;;  %v21_v52 = vld [vmem:[%s554_s1] sm:$0xff] }
  0x12   :  { %81 = vmatprep.subr.mxu0 %v36_v22  ;;  %288 = vmatpush3.msra.mxu1 %v148_v35  ;;  %v144_v51 = vld [vmem:[%s555_s3 + $0x30] sm:$0xff]  ;;  %v159_v53 = vld [vmem:[%s555_s3 + $0xa8] sm:$0xff]  ;;  %v20_v54 = vld [vmem:[%s556_s0] sm:$0xff] }
  0x13   :  { %82 = vmatpush1.msra.mxu0 %v35_v24  ;;  %289 = vmatprep.subr.mxu1 %v163_v37  ;;  %v143_v55 = vld [vmem:[%s555_s3 + $0x28] sm:$0xff]  ;;  %v158_v56 = vld [vmem:[%s555_s3 + $0xa0] sm:$0xff]  ;;  %v157_v58 = vld [vmem:[%s555_s3 + $0x98] sm:$0xff] }
  0x14   :  { %83 = vmatprep.subr.mxu0 %v34_v26  ;;  %290 = vmatpush3.msra.mxu1 %v147_v39  ;;  %v142_v57 = vld [vmem:[%s555_s3 + $0x20] sm:$0xff]  ;;  %v141_v59 = vld [vmem:[%s555_s3 + $0x18] sm:$0xff]  ;;  %v156_v60 = vld [vmem:[%s555_s3 + $0x90] sm:$0xff]  ;;  %v248_v26 = vand.u32 127, %v55_v2 }
  0x15   :  { %84 = vmatpush1.msra.mxu0 %v33_v28  ;;  %291 = vmatprep.subr.mxu1 %v162_v41  ;;  %v140_v61 = vld [vmem:[%s555_s3 + $0x10] sm:$0xff]  ;;  %v155_v62 = vld [vmem:[%s555_s3 + $0x88] sm:$0xff]  ;;  %v154_v0 = vld [vmem:[%s555_s3 + $0x80] sm:$0xff] }
  0x16   :  { %85 = vmatprep.subr.mxu0 %v32_v30  ;;  %292 = vmatpush3.msra.mxu1 %v146_v43  ;;  %v139_v63 = vld [vmem:[%s555_s3 + $0x8] sm:$0xff]  ;;  %v138_v1 = vld [vmem:[%s555_s3] sm:$0xff]  ;;  %vm250_vm0 = vcmp.ge.s32.totalorder %v248_v26, 1  ;;  %vm251_vm1 = vcmp.lt.s32.totalorder %v248_v26, 2  ;;  %vm249_vm4 = vcmp.lt.s32.totalorder %v248_v26, 1 }
  0x17   :  { %86 = vmatpush1.msra.mxu0 %v31_v32  ;;  %293 = vmatprep.subr.mxu1 %v161_v45  ;;  %v53_v5 = vld [vmem:[%s557_s2] sm:$0x3]  ;;  %vm252_vm3 = vmand %vm250_vm0, %vm251_vm1 }
  0x18   :  { %87 = vmatprep.subr.mxu0 %v30_v34  ;;  %294 = vmatpush3.msra.mxu1 %v145_v47  ;;  %v58_v7 = vrot.slane %v53_v5, %v57_v4  ;;  %v62_v8 = vrot.slane %v53_v5, %v61_v6  ;;  %v276_v16 = vld [vmem:[%s558_s4] ss:$0 sm:$0xff] }
  0x19   :  { %88 = vmatpush1.msra.mxu0 %v29_v36  ;;  %295 = vmatprep.subr.mxu1 %v160_v49 }
  0x1a   :  { %89 = vmatprep.subr.mxu0 %v28_v38  ;;  %296 = vmatpush3.msra.mxu1 %v144_v51 }
  0x1b   :  { %90 = vmatpush1.msra.mxu0 %v27_v40  ;;  %297 = vmatprep.subr.mxu1 %v159_v53 }
  0x1c   :  { %91 = vmatprep.subr.mxu0 %v26_v42  ;;  %298 = vmatpush3.msra.mxu1 %v143_v55 }
  0x1d   :  { %92 = vmatpush1.msra.mxu0 %v25_v44  ;;  %299 = vmatprep.subr.mxu1 %v158_v56 }
  0x1e   :  { %93 = vmatprep.subr.mxu0 %v24_v46  ;;  %300 = vmatpush3.msra.mxu1 %v142_v57 }
  0x1f   :  { %94 = vmatpush1.msra.mxu0 %v23_v48  ;;  %301 = vmatprep.subr.mxu1 %v157_v58 }
  0x20   :  { %95 = vmatprep.subr.mxu0 %v22_v50  ;;  %302 = vmatpush3.msra.mxu1 %v141_v59 }
  0x21   :  { %96 = vmatpush1.msra.mxu0 %v21_v52  ;;  %303 = vmatprep.subr.mxu1 %v156_v60 }
  0x22   :  { %130 = vmatmul.mubr.f32.vlgmr.msra.gmra.mxu0 %v20_v54  ;;  %304 = vmatpush3.msra.mxu1 %v140_v61 }
  0x23   :  { %305 = vmatprep.subr.mxu1 %v155_v62 }
  0x24   :  { %306 = vmatpush3.msra.mxu1 %v139_v63 }
  0x25   :  { %307 = vmatprep.subr.mxu1 %v154_v0 }
  0x26   :  { %308 = vmatpush3.msra.mxu1 %v138_v1 }
  0xe2   :  { %v131_v9 = vpop.f32.mrf.mxu0 }
  0xe3   :  { %v132_v10 = vadd.f32 %v131_v9, %v58_v7 }
  0xe4   :  { %v133_v11 = vpop.f32.mrf.mxu0 }
  0xe5   :  { %v134_v12 = vadd.f32 %v133_v11, %v62_v8  ;;  %v136_v14 = vmax.f32 %v132_v10, 0.0 }
  0xe7   :  { %v137_v13 = vmax.f32 %v134_v12, 0.0 }
  0xe9   :  { %241 = vmatprep.mubr.f32.mxu1 %v137_v13 }
  0xea   :  { %242 = vmatmul.mubr.f32.vlgmr.msra.gmra.mxu1 %v136_v14 }
 0x1aa   :  { %v309_v15 = vpop.f32.mrf.mxu1 }
 0x1ac   :  { %v310_v17 = vpop.f32.mrf.mxu1 }
 0x1ad   :  { %v311_v18 = vadd.f32 %v310_v17, %v309_v15 }
 0x1af   :  { %v244_v19 = vadd.f32 %v311_v18, %v276_v16 }
 0x1b1   :  { %v255_v20 = vand.u32 2147483647, %v244_v19  ;;  %v254_v32 = vmax.f32 %v244_v19, 0.0 }
 0x1b3   :  { %v256_v21 = vsub.f32 0.0, %v255_v20 }
 0x1b5   :  { %v257_v22 = vmul.f32 1.442695, %v256_v21 }
 0x1b7   :  { %313 = vpow2.f32 %v257_v22 }
 0x1c4   :  { %v314_v23 = vpop.eup %313 }
 0x1c5   :  { %v259_v24 = vadd.f32 1.0, %v314_v23  ;;  %v262_v25 = vmul.f32 -0.5, %v314_v23  ;;  %v265_v28 = vand.u32 2147483647, %v314_v23 }
 0x1c7   :  { %315 = vlog2.f32 %v259_v24  ;;  %v263_v27 = vadd.f32 1.0, %v262_v25  ;;  %vm266_vm2 = vcmp.lt.f32.partialorder %v265_v28, 0.0004427343 }
 0x1c8   :  { %317 = vtanh.f32 %v244_v19 }
 0x1c9   :  { %v264_v31 = vmul.f32 %v314_v23, %v263_v27 }
 0x1d4   :  { %v316_v29 = vpop.eup %315 }
 0x1d5   :  { %v261_v30 = vmul.f32 0.6931472, %v316_v29  ;;  %v318_v35 = vpop.eup %317 }
 0x1d7   :  { %v267_v33 = vsel %vm266_vm2, %v264_v31, %v261_v30 }
 0x1d8   :  { %v268_v34 = vadd.f32 %v267_v33, %v254_v32 }
 0x1da   :  { %v269_v36 = vsel %vm252_vm3, %v268_v34, %v244_v19 }
 0x1db   :  { %v270_v37 = vsel %vm249_vm4, %v318_v35, %v269_v36 }
 0x1dc   :  { %271 = vst [vmem:[%s559_s5] sm:$0xff] %v270_v37 }

</bundles_post_ra>
